<compile_context>
chip_gen: v7x
topology: tpu7x:2x2x1
jax: 0.10.0
libtpu: 0.0.40
codegen_flags: <defaults>
</compile_context>

<pallas_src>
import functools

import jax
import jax.numpy as jnp
from jax.experimental import pallas as pl
from jax.experimental.pallas import tpu as pltpu

HIDDEN = 50
HIDDEN_PAD = 64                        # lane/sublane-friendly hidden width (zero-filled)
MAX_TILE_ROWS = 16384                  # sanity cap on batch-tile rows
VMEM_BUDGET_BYTES = 24 * 1024 * 1024   # target working set (x double-buffer + temps + out)
VMEM_LIMIT_BYTES = 40 * 1024 * 1024    # raised scoped-VMEM limit (headroom over budget,
                                       # still < v7x 64 MiB physical per TensorCore)


def _discriminator_kernel(x_ref, w1_ref, b1_ref, w2_ref, b2_ref, w3_ref, b3_ref, o_ref):
    """One batch tile of the full forward pass, entirely VMEM-resident."""
    x = x_ref[...]
    h1 = jnp.tanh(
        jnp.dot(x, w1_ref[...], preferred_element_type=jnp.float32) + b1_ref[...]
    )
    h2 = jnp.tanh(
        jnp.dot(h1, w2_ref[...], preferred_element_type=jnp.float32) + b2_ref[...]
    )
    # Final Linear(50 -> 1), lane-dense: contract the 64-wide hidden axis so the batch
    # lands on lanes -> (1, TB) logits slab -> full sigmoid vregs + unmasked stores.
    logits = jax.lax.dot_general(
        w3_ref[...], h2,
        dimension_numbers=(((1,), (1,)), ((), ())),
        preferred_element_type=jnp.float32,
    ) + b3_ref[...]
    o_ref[...] = jax.nn.sigmoid(logits)


def _round_up(n, m):
    return ((n + m - 1) // m) * m


def _auto_tile(batch, features):
    """Pick a batch tile from the VMEM budget (lane-padding-aware), multiple of 128."""
    f_pad = _round_up(max(features, 1), 128)      # x minor dim is lane-padded in VMEM
    bytes_per_row = (
        2 * 4 * f_pad      # x tile (f32, lane-padded), double-buffered
        + 2 * 4 * 128      # h1 / h2 temporaries: 64-wide occupies full 128-lane tiles
        + 2 * 4            # (1, TB) output block, double-buffered
    )
    tile = VMEM_BUDGET_BYTES // bytes_per_row
    tile = min(tile, MAX_TILE_ROWS)
    tile = max(128, (tile // 128) * 128)          # output block lane dim must be %128
    if batch <= tile:
        return batch
    # Prefer an even number of grid steps so both v7x TensorCores get equal work.
    steps = -(-batch // tile)
    if steps % 2 == 1:
        steps += 1
        tile = max(128, _round_up(-(-batch // steps), 128))
    return tile


def _resolve_tile(batch, features, tile_rows):
    if tile_rows is None:
        return _auto_tile(batch, features)
    if tile_rows >= batch:
        return batch
    # Multi-tile: the (1, TB) output block needs TB % 128 == 0.
    return min(batch, _round_up(tile_rows, 128))


def init_params(key, input_size):
    """Deterministic init mirroring PyTorch nn.Linear default U(-1/sqrt(fan_in), +)."""
    ks = jax.random.split(key, 6)

    def linear(kw, kb, fan_in, fan_out):
        bound = float(fan_in) ** -0.5
        w = jax.random.uniform(kw, (fan_in, fan_out), jnp.float32, -bound, bound)
        b = jax.random.uniform(kb, (fan_out,), jnp.float32, -bound, bound)
        return w, b

    w1, b1 = linear(ks[0], ks[1], input_size, HIDDEN)
    w2, b2 = linear(ks[2], ks[3], HIDDEN, HIDDEN)
    w3, b3 = linear(ks[4], ks[5], HIDDEN, 1)
    return (w1, b1, w2, b2, w3, b3)


@functools.partial(jax.jit, static_argnames=("tile_rows",))
def discriminator_forward(x, params, tile_rows=None):
    w1, b1, w2, b2, w3, b3 = params
    B, F = x.shape
    TB = _resolve_tile(B, F, tile_rows)
    grid = (pl.cdiv(B, TB),)

    # Glue (tiny, constant-shaped weight transforms): zero-pad HIDDEN 50 -> 64 and lift
    # biases to 2-D rows. Padded columns remain exactly 0 through tanh, and the padded
    # rows of w2 / lanes of w3 are zero, so the result is bit-for-bit the 50-wide math.
    w1p = jnp.zeros((F, HIDDEN_PAD), jnp.float32).at[:, :HIDDEN].set(w1)
    b1p = jnp.zeros((1, HIDDEN_PAD), jnp.float32).at[0, :HIDDEN].set(b1)
    w2p = jnp.zeros((HIDDEN_PAD, HIDDEN_PAD), jnp.float32).at[:HIDDEN, :HIDDEN].set(w2)
    b2p = jnp.zeros((1, HIDDEN_PAD), jnp.float32).at[0, :HIDDEN].set(b2)
    w3p = jnp.zeros((1, HIDDEN_PAD), jnp.float32).at[0, :HIDDEN].set(w3[:, 0])
    b3p = b3.reshape(1, 1).astype(jnp.float32)

    cost = pl.CostEstimate(
        flops=2 * B * (F * HIDDEN + HIDDEN * HIDDEN + HIDDEN),
        transcendentals=B * (2 * HIDDEN_PAD + 1),
        bytes_accessed=4 * (B * F + B
                            + F * HIDDEN_PAD + HIDDEN_PAD * HIDDEN_PAD
                            + 3 * HIDDEN_PAD + 1),
    )

    out = pl.pallas_call(
        _discriminator_kernel,
        out_shape=jax.ShapeDtypeStruct((1, B), jnp.float32),   # lane-dense output slab
        grid=grid,
        in_specs=[
            pl.BlockSpec((TB, F), lambda i: (i, 0)),            # x: batch-tiled (streamed)
            pl.BlockSpec((F, HIDDEN_PAD), lambda i: (0, 0)),    # weights: VMEM-resident
            pl.BlockSpec((1, HIDDEN_PAD), lambda i: (0, 0)),
            pl.BlockSpec((HIDDEN_PAD, HIDDEN_PAD), lambda i: (0, 0)),
            pl.BlockSpec((1, HIDDEN_PAD), lambda i: (0, 0)),
            pl.BlockSpec((1, HIDDEN_PAD), lambda i: (0, 0)),
            pl.BlockSpec((1, 1), lambda i: (0, 0)),
        ],
        out_specs=pl.BlockSpec((1, TB), lambda i: (0, i)),      # batch on lanes
        compiler_params=pltpu.CompilerParams(
            dimension_semantics=("parallel",),                  # megacore sharding on v7x
            vmem_limit_bytes=VMEM_LIMIT_BYTES,
        ),
        cost_estimate=cost,
    )(x, w1p, b1p, w2p, b2p, w3p, b3p)

    return out.reshape(B, 1)   # shape (batch, 1), matching the PyTorch module


def _reference_forward(x, params):
    w1, b1, w2, b2, w3, b3 = params
    h1 = jnp.tanh(x @ w1 + b1)
    h2 = jnp.tanh(h1 @ w2 + b2)
    return jax.nn.sigmoid(h2 @ w3 + b3)


if __name__ == "__main__":
    key = jax.random.PRNGKey(0)
    kx, kp, kx2 = jax.random.split(key, 3)

    input_size = 32
    params = init_params(kp, input_size)

    # Small single-tile case.
    x = jax.random.normal(kx, (8, input_size), jnp.float32)
    out = discriminator_forward(x, params)
    jax.block_until_ready(out)
    assert out.shape == (8, 1), out.shape
    ref = _reference_forward(x, params)
    assert jnp.allclose(out, ref, rtol=1e-5, atol=2e-5), "mismatch vs pure-JAX reference"

    # Multi-tile case with a ragged final block (exercises the batch-tiled grid path and
    # the lane-dense output store; TB is forced to a 128 multiple for the output block).
    x2 = jax.random.normal(kx2, (300, input_size), jnp.float32)
    out2 = discriminator_forward(x2, params, tile_rows=128)
    jax.block_until_ready(out2)
    assert out2.shape == (300, 1), out2.shape
    ref2 = _reference_forward(x2, params)
    assert jnp.allclose(out2, ref2, rtol=1e-5, atol=2e-5), "mismatch vs pure-JAX reference (tiled)"

    print("KERNEL_OK")
</pallas_src>

<mosaic_0001>
module attributes {stable_mosaic.version = 11 : i64} {
  func.func @_discriminator_kernel(%arg0: i32, %arg1: memref<8x32xf32, #tpu.memory_space<vmem>>, %arg2: memref<32x64xf32, #tpu.memory_space<vmem>>, %arg3: memref<1x64xf32, #tpu.memory_space<vmem>>, %arg4: memref<64x64xf32, #tpu.memory_space<vmem>>, %arg5: memref<1x64xf32, #tpu.memory_space<vmem>>, %arg6: memref<1x64xf32, #tpu.memory_space<vmem>>, %arg7: memref<1x1xf32, #tpu.memory_space<vmem>>, %arg8: memref<1x8xf32, #tpu.memory_space<vmem>>) attributes {dimension_semantics = [#tpu.dimension_semantics<parallel>], iteration_bounds = array<i64: 1>, scalar_prefetch = 0 : i64, scratch_operands = 0 : i64, tpu.core_type = #tpu.core_type<tc>, window_params = [{transform_indices = @transform_0, window_bounds = array<i64: 8, 32>}, {pipeline_mode = #tpu.pipeline_mode<synchronous>, transform_indices = @transform_1, window_bounds = array<i64: 32, 64>}, {pipeline_mode = #tpu.pipeline_mode<synchronous>, transform_indices = @transform_2, window_bounds = array<i64: 1, 64>}, {pipeline_mode = #tpu.pipeline_mode<synchronous>, transform_indices = @transform_3, window_bounds = array<i64: 64, 64>}, {pipeline_mode = #tpu.pipeline_mode<synchronous>, transform_indices = @transform_4, window_bounds = array<i64: 1, 64>}, {pipeline_mode = #tpu.pipeline_mode<synchronous>, transform_indices = @transform_5, window_bounds = array<i64: 1, 64>}, {pipeline_mode = #tpu.pipeline_mode<synchronous>, transform_indices = @transform_6, window_bounds = array<i64: 1, 1>}, {transform_indices = @transform_7, window_bounds = array<i64: 1, 8>}]} {
    %c0 = arith.constant 0 : index
    %c0_0 = arith.constant 0 : index
    %0 = vector.load %arg1[%c0, %c0_0] : memref<8x32xf32, #tpu.memory_space<vmem>>, vector<8x32xf32>
    %c0_1 = arith.constant 0 : index
    %c0_2 = arith.constant 0 : index
    %1 = vector.load %arg2[%c0_1, %c0_2] : memref<32x64xf32, #tpu.memory_space<vmem>>, vector<32x64xf32>
    %cst = arith.constant dense<0.000000e+00> : vector<8x64xf32>
    %2 = tpu.matmul %0, %1, %cst {dimension_numbers = #tpu.dot_dimension_numbers<[1], [0], [0], [1], [0, 0, 1, 1], [], []>} : vector<8x32xf32>, vector<32x64xf32>, vector<8x64xf32> -> vector<8x64xf32>
    %c0_3 = arith.constant 0 : index
    %c0_4 = arith.constant 0 : index
    %3 = vector.load %arg3[%c0_3, %c0_4] : memref<1x64xf32, #tpu.memory_space<vmem>>, vector<1x64xf32>
    %4 = vector.broadcast %3 : vector<1x64xf32> to vector<8x64xf32>
    %5 = arith.addf %2, %4 : vector<8x64xf32>
    %6 = math.tanh %5 : vector<8x64xf32>
    %c0_5 = arith.constant 0 : index
    %c0_6 = arith.constant 0 : index
    %7 = vector.load %arg4[%c0_5, %c0_6] : memref<64x64xf32, #tpu.memory_space<vmem>>, vector<64x64xf32>
    %cst_7 = arith.constant dense<0.000000e+00> : vector<8x64xf32>
    %8 = tpu.matmul %6, %7, %cst_7 {dimension_numbers = #tpu.dot_dimension_numbers<[1], [0], [0], [1], [0, 0, 1, 1], [], []>} : vector<8x64xf32>, vector<64x64xf32>, vector<8x64xf32> -> vector<8x64xf32>
    %c0_8 = arith.constant 0 : index
    %c0_9 = arith.constant 0 : index
    %9 = vector.load %arg5[%c0_8, %c0_9] : memref<1x64xf32, #tpu.memory_space<vmem>>, vector<1x64xf32>
    %10 = vector.broadcast %9 : vector<1x64xf32> to vector<8x64xf32>
    %11 = arith.addf %8, %10 : vector<8x64xf32>
    %12 = math.tanh %11 : vector<8x64xf32>
    %c0_10 = arith.constant 0 : index
    %c0_11 = arith.constant 0 : index
    %13 = vector.load %arg6[%c0_10, %c0_11] : memref<1x64xf32, #tpu.memory_space<vmem>>, vector<1x64xf32>
    %cst_12 = arith.constant dense<0.000000e+00> : vector<1x8xf32>
    %14 = tpu.matmul %13, %12, %cst_12 {dimension_numbers = #tpu.dot_dimension_numbers<[1], [1], [0], [0], [0, 0, 1, 0], [], []>} : vector<1x64xf32>, vector<8x64xf32>, vector<1x8xf32> -> vector<1x8xf32>
    %c0_13 = arith.constant 0 : index
    %c0_14 = arith.constant 0 : index
    %15 = vector.load %arg7[%c0_13, %c0_14] : memref<1x1xf32, #tpu.memory_space<vmem>>, vector<1x1xf32>
    %16 = vector.broadcast %15 : vector<1x1xf32> to vector<1x8xf32>
    %17 = arith.addf %14, %16 : vector<1x8xf32>
    %18 = arith.negf %17 : vector<1x8xf32>
    %19 = math.exp %18 : vector<1x8xf32>
    %cst_15 = arith.constant 1.000000e+00 : f32
    %20 = vector.broadcast %cst_15 : f32 to vector<1x8xf32>
    %21 = arith.addf %20, %19 : vector<1x8xf32>
    %22 = arith.divf %20, %21 : vector<1x8xf32>
    %c0_16 = arith.constant 0 : index
    %c0_17 = arith.constant 0 : index
    %23 = vector.load %arg8[%c0_16, %c0_17] : memref<1x8xf32, #tpu.memory_space<vmem>>, vector<1x8xf32>
    tpu.vector_store %arg8[%c0_16, %c0_17], %22 {strides = array<i32>} : memref<1x8xf32, #tpu.memory_space<vmem>>, vector<1x8xf32>,
    return
  }
  func.func @transform_0(%arg0: i32) -> (i32, i32) {
    %c0_i32 = arith.constant 0 : i32
    %c0_i32_0 = arith.constant 0 : i32
    return %arg0, %c0_i32 : i32, i32
  }
  func.func @transform_1(%arg0: i32) -> (i32, i32) {
    %c0_i32 = arith.constant 0 : i32
    %c0_i32_0 = arith.constant 0 : i32
    %c0_i32_1 = arith.constant 0 : i32
    return %c0_i32, %c0_i32_0 : i32, i32
  }
  func.func @transform_2(%arg0: i32) -> (i32, i32) {
    %c0_i32 = arith.constant 0 : i32
    %c0_i32_0 = arith.constant 0 : i32
    %c0_i32_1 = arith.constant 0 : i32
    return %c0_i32, %c0_i32_0 : i32, i32
  }
  func.func @transform_3(%arg0: i32) -> (i32, i32) {
    %c0_i32 = arith.constant 0 : i32
    %c0_i32_0 = arith.constant 0 : i32
    %c0_i32_1 = arith.constant 0 : i32
    return %c0_i32, %c0_i32_0 : i32, i32
  }
  func.func @transform_4(%arg0: i32) -> (i32, i32) {
    %c0_i32 = arith.constant 0 : i32
    %c0_i32_0 = arith.constant 0 : i32
    %c0_i32_1 = arith.constant 0 : i32
    return %c0_i32, %c0_i32_0 : i32, i32
  }
  func.func @transform_5(%arg0: i32) -> (i32, i32) {
    %c0_i32 = arith.constant 0 : i32
    %c0_i32_0 = arith.constant 0 : i32
    %c0_i32_1 = arith.constant 0 : i32
    return %c0_i32, %c0_i32_0 : i32, i32
  }
  func.func @transform_6(%arg0: i32) -> (i32, i32) {
    %c0_i32 = arith.constant 0 : i32
    %c0_i32_0 = arith.constant 0 : i32
    %c0_i32_1 = arith.constant 0 : i32
    return %c0_i32, %c0_i32_0 : i32, i32
  }
  func.func @transform_7(%arg0: i32) -> (i32, i32) {
    %c0_i32 = arith.constant 0 : i32
    %c0_i32_0 = arith.constant 0 : i32
    return %c0_i32, %arg0 : i32, i32
  }
}

</mosaic_0001>

<bundles_post_ra>
// kernel: discriminator_forward.1
= control target key start
LH: loop header
LB: loop body
LE: loop exit
PB: predicated region body
PF: predicated region fallthrough
CT: control target
= control target key end

     0   :  { %s540_s0 = inlined_call_operand.vmem [shape: f32[8,32], index: 0, kind: input, shape index: {}]   ;;  %s541_s1 = inlined_call_operand.vmem [shape: f32[32,64], index: 1, kind: input, shape index: {}]   ;;  %s542_s2 = inlined_call_operand.vmem [shape: f32[1,64], index: 2, kind: input, shape index: {}]   ;;  %s543_s3 = inlined_call_operand.vmem [shape: f32[64,64], index: 3, kind: input, shape index: {}]   ;;  %s544_s4 = inlined_call_operand.vmem [shape: f32[1,64], index: 4, kind: input, shape index: {}]   ;;  %s545_s5 = inlined_call_operand.vmem [shape: f32[1,64], index: 5, kind: input, shape index: {}]   ;;  %s546_s6 = inlined_call_operand.<no memory space> [shape: f32[1,1], index: 6, kind: input, shape index: {}]   ;;  %s547_s7 = inlined_call_operand.hbm [shape: f32[1,8], index: 7, kind: output, shape index: {}]  }
   0x1   :  { %v12_v0 = vstv %s546_s6 }
   0x2   :  { %13 = vst [vmem:[#allocation2] sm:$0x1] %v12_v0 }
   0x3   :  { %v30_v1 = vld [vmem:[%s541_s1] sm:$0xff]  ;;  %v31_v2 = vld [vmem:[%s541_s1 + $0x8] sm:$0xff]  ;;  %v32_v3 = vld [vmem:[%s541_s1 + $0x10] sm:$0xff]  ;;  %v429_v4 = vmov 0.0|0.0   ;;  %vm430_vm0 = vmmov 0   ;;  %v431_v7 = vmov 0.0  }
   0x4   :  { %373 = vmatprep.subr.bf16.mxu0 %v429_v4  ;;  %v374_v5 = vpack.c.bf16 %v31_v2, %v30_v1  ;;  %v33_v6 = vld [vmem:[%s541_s1 + $0x18] sm:$0xff]  ;;  %346 = vmatprep.mubr.msk.f32.mxu0 %vm430_vm0, %v431_v7  ;;  %v116_v8 = vld [vmem:[%s543_s3] sm:$0xff]  ;;  %v117_v9 = vld [vmem:[%s543_s3 + $0x8] sm:$0xff] }
   0x5   :  { %379 = vmatprep.subr.bf16.mxu1 %v429_v4  ;;  %365 = vmatprep.mubr.msk.f32.mxu1 %vm430_vm0, %v431_v7 }
   0x6   :  { %14 = vsyncpa [#allocation4], 0  ;;  %375 = vmatpush3.bf16.msra.mxu0 %v374_v5  ;;  %v377_v10 = vpack.c.bf16 %v33_v6, %v32_v3  ;;  %v380_v11 = vpack.c.bf16 %v117_v9, %v116_v8  ;;  %v29_v12 = vld [vmem:[%s540_s0] sm:$0xff]  ;;  %vm41_vm1 = vcmask 261120   ;;  %v118_v13 = vld [vmem:[%s543_s3 + $0x10] sm:$0xff]  ;;  %vm131_vm2 = vcmask 523264  }
   0x7   :  { %376 = vmatprep.subr.bf16.mxu0 %v429_v4  ;;  %v119_v14 = vld [vmem:[%s543_s3 + $0x18] sm:$0xff]  ;;  %v120_v16 = vld [vmem:[%s543_s3 + $0x20] sm:$0xff]  ;;  %v121_v17 = vld [vmem:[%s543_s3 + $0x28] sm:$0xff]  ;;  %v432_v28 = vmov 0   ;;  %v213_v35 = vlaneseq  ;;  %vm299_vm3 = vcmask 57344  }
   0x8   :  { %381 = vmatpush3.bf16.msra.mxu1 %v380_v11  ;;  %v383_v15 = vpack.c.bf16 %v119_v14, %v118_v13  ;;  %v386_v18 = vpack.c.bf16 %v121_v17, %v120_v16  ;;  %v122_v19 = vld [vmem:[%s543_s3 + $0x30] sm:$0xff]  ;;  %v123_v20 = vld [vmem:[%s543_s3 + $0x38] sm:$0xff]  ;;  %v315_v22 = vld [vmem:[%s542_s2] ss:$0 sm:$0xff]  ;;  %396 = vset.pattern.permute.xlu0 %v432_v28 }
   0x9   :  { %382 = vmatprep.subr.bf16.mxu1 %v429_v4  ;;  %v389_v21 = vpack.c.bf16 %v123_v20, %v122_v19  ;;  %v207_v27 = vld [vmem:[#allocation2] sm:$0x1]  ;;  %v214_v36 = vshrl.u32 %v213_v35, 7 }
   0xa   :  { %378 = vmatpush3.bf16.msra.mxu0 %v377_v10  ;;  %210 = vperm.xlu0 %396, %v207_v27   ;;  %v317_v29 = vld [vmem:[%s544_s4] ss:$0 sm:$0xff]  ;;  %s433_s4 = smov [#allocation3]  }
   0xb   :  { %368 = vmatprep.subr.mxu0 %v431_v7  ;;  %v206_v34 = vld [vmem:[%s545_s5] sm:$0x1]  ;;  %v215_v37 = vsub.s32 0, %v214_v36  ;;  %s307_s30 = sshll.u32 %s433_s4, 4  ;;  %s308_s30 = int_to_ptr.vmem [resolvable:$true] %s307_s30 }
   0xc   :  { %384 = vmatpush3.bf16.msra.mxu1 %v383_v15  ;;  %s405_s5 = scalar_lea.vmem %s308_s30, 16  ;;  %s409_s8 = scalar_lea.vmem %s308_s30, 32 }
   0xd   :  { %347 = vmatmul.mubr.msk.f32.vlgmr.msra.gmra.mrb[0].mxu0 %vm41_vm1, %v29_v12  ;;  %385 = vmatprep.subr.bf16.mxu1 %v429_v4  ;;  %p406_p0 = scmp.ne.s32.totalorder %s308_s30, %s405_s5  ;;  %p410_p1 = scmp.lt.s32.totalorder %s308_s30, %s308_s30 }
   0xe   :  { %370 = vmatprep.mubr.msk.f32.mxu0 %vm430_vm0, %v431_v7  ;;  %p411_p2 = scmp.lt.s32.totalorder %s409_s8, %s405_s5 }
  0x10   :  { %387 = vmatpush3.bf16.msra.mxu1 %v386_v18  ;;  %p412_p3 = por %p411_p2, %p410_p1 }
  0x11   :  { %388 = vmatprep.subr.bf16.mxu1 %v429_v4 }
  0x12   :  { %p413_p4 = pnand %p412_p3, %p406_p0 }
  0x14   :  { %390 = vmatpush3.bf16.msra.mxu1 %v389_v21 }
  0x89   :  { %v211_v38 = vpop.permute.xlu0 %210 }
  0x8a   :  { %v216_v39 = vrot.slane %v211_v38, %v215_v37 }
  0xe0   :  { %v111_v23 = vpop.f32.mrb[0].mxu0 }
  0xe1   :  { %v112_v24 = vadd.f32 %v315_v22, %v111_v23  ;;  %v348_v25 = vpop.f32.mrb[1].mxu0 }
  0xe3   :  { %397 = vtanh.f32 %v112_v24 }
  0xed   :  { %v398_v26 = vpop.eup %397 }
  0xee   :  { %366 = vmatmul.mubr.msk.f32.vlgmr.msra.gmra.mrb[0].mxu1 %vm131_vm2, %v398_v26 }
 0x1c1   :  { %v201_v30 = vpop.f32.mrb[0].mxu1 }
 0x1c2   :  { %v202_v31 = vadd.f32 %v317_v29, %v201_v30  ;;  %v367_v32 = vpop.f32.mrb[1].mxu1 }
 0x1c4   :  { %399 = vtanh.f32 %v202_v31 }
 0x1ce   :  { %v400_v33 = vpop.eup %399 }
 0x1cf   :  { %369 = vmatpush3.xpose.msk.msra.mxu0 %vm131_vm2, %v400_v33 }
 0x1d2   :  { %371 = vmatmul.mubr.msk.f32.vlgmr.msra.gmra.mrb[2].mxu0 %vm131_vm2, %v206_v34 }
 0x2a5   :  { %v289_v40 = vpop.f32.mrb[2].mxu0 }
 0x2a6   :  { %v290_v41 = vadd.f32 %v289_v40, %v216_v39  ;;  %v372_v42 = vpop.f32.mrb[3].mxu0 }
 0x2a8   :  { %v321_v43 = vmul.f32 -1.442695, %v290_v41 }
 0x2aa   :  { %401 = vpow2.f32 %v321_v43 }
 0x2b4   :  { %v402_v44 = vpop.eup %401 }
 0x2b5   :  { %v296_v45 = vadd.f32 1.0, %v402_v44 }
 0x2b7   :  { %403 = vrcp.f32 %v296_v45 }
 0x2c1   :  { %v404_v46 = vpop.eup %403 }
 0x2c2   :  { %300 = vst.msk [vmem:[#allocation3] sm:$0x1] %vm299_vm3, %v404_v46 }
 0x2c3   :  { %416 = shalt.err (!%p413_p4)
}
 0x2c4   :  { %s417_s6 = scalar_lea.hbm %s547_s7, 16 }
 0x2c5   :  { %p418_p5 = scmp.ne.s32.totalorder %s547_s7, %s417_s6  ;;  %p421_p6 = scmp.lt.u32.totalorder %s417_s6, %s547_s7 }
 0x2c7   :  { %p423_p7 = pnand %p421_p6, %p418_p5 }
 0x2c9   :  { %426 = shalt.err (!%p423_p7)
}
 0x2ca   :  { %310 = dma.vmem_to_hbm [thread:$0]  %s308_s30, 16, %s547_s7, [#allocation4]  }
 0x2cb   :  { %427 = dma.done.wait [#allocation4], 16  }
 0x2cc   :  { %428 = vsyncadd [#allocation4], 4294967280 }
 0x2cd   :  { %314 = vsyncpa [#allocation4], 1 }

</bundles_post_ra>
